<compile_context>
chip_gen: v7x
topology: tpu7x:2x2x1
jax: 0.10.0
libtpu: 0.0.40
codegen_flags: <defaults>
</compile_context>

<pallas_src>
import jax
import jax.numpy as jnp
from jax.experimental import pallas as pl
from jax.experimental.pallas import tpu as pltpu

IN_FEATURES = 111   # is_mimic == 1
H1 = 200
H2 = 200
H3 = 10
N_CLASS = 2

# Lane-aligned (padded) hidden dims.
PAD_H1 = 256
PAD_H2 = 256
PAD_H3 = 128


def _round_up(n, m):
    return ((n + m - 1) // m) * m


def _mlp_kernel(x_ref,
                w1_ref, b1_ref,
                w2_ref, b2_ref,
                w3_ref, b3_ref,
                wd_ref, bd_ref,
                out_ref):
    # bf16 into the MXU, f32 accumulation / elementwise everywhere else.
    x = x_ref[...].astype(jnp.bfloat16)                      # (tm, 111)

    # fc1 + relu   (dropout: identity in eval mode)
    h = jnp.dot(x, w1_ref[...], preferred_element_type=jnp.float32) + b1_ref[...]
    h = jnp.maximum(h, 0.0)

    # fc2 + relu
    h = jnp.dot(h.astype(jnp.bfloat16), w2_ref[...],
                preferred_element_type=jnp.float32) + b2_ref[...]
    h = jnp.maximum(h, 0.0)

    # fc3 + relu  -> (tm, 128); padded lanes are exactly 0 (zero weights/bias, relu)
    h = jnp.dot(h.astype(jnp.bfloat16), w3_ref[...],
                preferred_element_type=jnp.float32) + b3_ref[...]
    h = jnp.maximum(h, 0.0)

    # fc_final + 2-class log_softmax, analytic form (f32 throughout):
    #   d = z1 - z0,  log_softmax = [-softplus(d), -softplus(-d)]
    d = jnp.sum(h * wd_ref[...], axis=-1, keepdims=True) + bd_ref[...]   # (tm, 1)
    sp = jnp.log(1.0 + jnp.exp(-jnp.abs(d)))                 # stable softplus tail
    out_ref[:, 0:1] = (-(jnp.maximum(d, 0.0) + sp)).astype(out_ref.dtype)
    out_ref[:, 1:2] = (-(jnp.maximum(-d, 0.0) + sp)).astype(out_ref.dtype)


def init_params(key):
    """Deterministic init mimicking PyTorch Linear (uniform +/- 1/sqrt(fan_in)).
    Weights stored as (in, out); biases as (1, out)."""
    dims = [(IN_FEATURES, H1), (H1, H2), (H2, H3), (H3, N_CLASS)]
    params = {}
    for i, (fan_in, fan_out) in enumerate(dims, start=1):
        key, kw, kb = jax.random.split(key, 3)
        bound = 1.0 / jnp.sqrt(float(fan_in))
        params[f"w{i}"] = jax.random.uniform(
            kw, (fan_in, fan_out), jnp.float32, -bound, bound)
        params[f"b{i}"] = jax.random.uniform(
            kb, (1, fan_out), jnp.float32, -bound, bound)
    return params


def prepare_padded_params(params):
    """Zero-pad hidden weights/biases to lane-aligned shapes (weights -> bf16) and
    pre-compute the f32 class-difference column of fc_final."""
    def pad_w(w, rows, cols):
        out = jnp.zeros((rows, cols), jnp.float32)
        out = out.at[:w.shape[0], :w.shape[1]].set(w)
        return out.astype(jnp.bfloat16)

    def pad_b(b, cols):
        out = jnp.zeros((1, cols), jnp.float32)
        out = out.at[:, :b.shape[1]].set(b)
        return out

    # fc_final reduced to a single f32 difference column: d = z1 - z0
    wd = jnp.zeros((1, PAD_H3), jnp.float32).at[0, :H3].set(
        params["w4"][:, 1] - params["w4"][:, 0])
    bd = (params["b4"][:, 1:2] - params["b4"][:, 0:1]).astype(jnp.float32)  # (1, 1)

    return {
        "w1": pad_w(params["w1"], IN_FEATURES, PAD_H1),  # (111, 256) bf16
        "b1": pad_b(params["b1"], PAD_H1),
        "w2": pad_w(params["w2"], PAD_H1, PAD_H2),
        "b2": pad_b(params["b2"], PAD_H2),
        "w3": pad_w(params["w3"], PAD_H2, PAD_H3),
        "b3": pad_b(params["b3"], PAD_H3),
        "wd": wd,
        "bd": bd,
    }


def net_forward(x, padded_params, *, tm=512):
    """x: (B, 111) float32. padded_params: output of prepare_padded_params.
    Returns (B, 2) float32 log-probabilities."""
    B = x.shape[0]
    assert x.shape[1] == IN_FEATURES

    # Sublane-aligned batch tile; large by default (grid-step overhead bound
    # otherwise).  Ensure >= 2 grid steps when possible so v7x's two TensorCores
    # both get work via the "parallel" batch axis.
    tm_eff = min(tm, _round_up(B, 8))
    if B > 8 and pl.cdiv(B, tm_eff) < 2:
        tm_eff = _round_up(pl.cdiv(B, 2), 8)
    grid_m = pl.cdiv(B, tm_eff)
    b_pad = grid_m * tm_eff

    # Only pay a (cheap, rows-only) pad on a ragged batch edge.
    if b_pad != B:
        x = jnp.pad(x, ((0, b_pad - B), (0, 0)))

    p = padded_params

    def resident(arr):
        # Whole-array block, same block index every grid step -> stays in VMEM.
        return pl.BlockSpec(arr.shape, lambda i: (0, 0))

    flops = 2 * B * (IN_FEATURES * H1 + H1 * H2 + H2 * H3 + H3 * N_CLASS)
    param_bytes = sum(int(v.size) * v.dtype.itemsize for v in p.values())
    bytes_accessed = int(x.size) * x.dtype.itemsize + B * N_CLASS * 4 + param_bytes

    # v5e's default scoped VMEM is 16 MiB; only bump it for very large tiles.
    vmem_limit = 64 * 1024 * 1024 if tm_eff > 1024 else None

    out = pl.pallas_call(
        _mlp_kernel,
        out_shape=jax.ShapeDtypeStruct((b_pad, N_CLASS), jnp.float32),
        grid=(grid_m,),
        in_specs=[
            pl.BlockSpec((tm_eff, IN_FEATURES), lambda i: (i, 0)),   # x tile
            resident(p["w1"]), resident(p["b1"]),
            resident(p["w2"]), resident(p["b2"]),
            resident(p["w3"]), resident(p["b3"]),
            resident(p["wd"]), resident(p["bd"]),
        ],
        out_specs=pl.BlockSpec((tm_eff, N_CLASS), lambda i: (i, 0)),
        compiler_params=pltpu.CompilerParams(
            dimension_semantics=("parallel",),
            vmem_limit_bytes=vmem_limit,
        ),
        cost_estimate=pl.CostEstimate(
            flops=flops, transcendentals=2 * B, bytes_accessed=bytes_accessed),
    )(x,
      p["w1"], p["b1"],
      p["w2"], p["b2"],
      p["w3"], p["b3"],
      p["wd"], p["bd"])

    return out if b_pad == B else out[:B]


def reference_forward(x, params):
    """Pure-JAX f32 reference matching the PyTorch module (eval mode)."""
    h = jnp.maximum(x @ params["w1"] + params["b1"], 0.0)
    h = jnp.maximum(h @ params["w2"] + params["b2"], 0.0)
    h = jnp.maximum(h @ params["w3"] + params["b3"], 0.0)
    logits = h @ params["w4"] + params["b4"]
    return jax.nn.log_softmax(logits, axis=-1)


if __name__ == "__main__":
    key = jax.random.PRNGKey(0)
    key_params, key_x = jax.random.split(key)

    params = init_params(key_params)
    padded_params = prepare_padded_params(params)

    B = 8
    x = jax.random.normal(key_x, (B, IN_FEATURES), dtype=jnp.float32)

    out = net_forward(x, padded_params)
    out = jax.block_until_ready(out)

    # sanity: shape, log-softmax rows exponentiate-and-sum to ~1, matches f32 reference
    assert out.shape == (B, N_CLASS)
    row_sums = jnp.sum(jnp.exp(out), axis=-1)
    assert bool(jnp.all(jnp.abs(row_sums - 1.0) < 1e-3))

    ref = reference_forward(x, params)
    assert bool(jnp.all(jnp.abs(out - ref) < 7e-2))  # bf16-weight tolerance

    print("KERNEL_OK")
</pallas_src>

<mosaic_0001>
module attributes {stable_mosaic.version = 11 : i64} {
  func.func @_mlp_kernel(%arg0: i32, %arg1: memref<8x111xf32, #tpu.memory_space<vmem>>, %arg2: memref<111x256xbf16, #tpu.memory_space<vmem>>, %arg3: memref<1x256xf32, #tpu.memory_space<vmem>>, %arg4: memref<256x256xbf16, #tpu.memory_space<vmem>>, %arg5: memref<1x256xf32, #tpu.memory_space<vmem>>, %arg6: memref<256x128xbf16, #tpu.memory_space<vmem>>, %arg7: memref<1x128xf32, #tpu.memory_space<vmem>>, %arg8: memref<1x128xf32, #tpu.memory_space<vmem>>, %arg9: memref<1x1xf32, #tpu.memory_space<vmem>>, %arg10: memref<8x2xf32, #tpu.memory_space<vmem>>) attributes {dimension_semantics = [#tpu.dimension_semantics<parallel>], iteration_bounds = array<i64: 1>, scalar_prefetch = 0 : i64, scratch_operands = 0 : i64, tpu.core_type = #tpu.core_type<tc>, window_params = [{transform_indices = @transform_0, window_bounds = array<i64: 8, 111>}, {pipeline_mode = #tpu.pipeline_mode<synchronous>, transform_indices = @transform_1, window_bounds = array<i64: 111, 256>}, {pipeline_mode = #tpu.pipeline_mode<synchronous>, transform_indices = @transform_2, window_bounds = array<i64: 1, 256>}, {pipeline_mode = #tpu.pipeline_mode<synchronous>, transform_indices = @transform_3, window_bounds = array<i64: 256, 256>}, {pipeline_mode = #tpu.pipeline_mode<synchronous>, transform_indices = @transform_4, window_bounds = array<i64: 1, 256>}, {pipeline_mode = #tpu.pipeline_mode<synchronous>, transform_indices = @transform_5, window_bounds = array<i64: 256, 128>}, {pipeline_mode = #tpu.pipeline_mode<synchronous>, transform_indices = @transform_6, window_bounds = array<i64: 1, 128>}, {pipeline_mode = #tpu.pipeline_mode<synchronous>, transform_indices = @transform_7, window_bounds = array<i64: 1, 128>}, {pipeline_mode = #tpu.pipeline_mode<synchronous>, transform_indices = @transform_8, window_bounds = array<i64: 1, 1>}, {transform_indices = @transform_9, window_bounds = array<i64: 8, 2>}]} {
    %c0 = arith.constant 0 : index
    %c0_0 = arith.constant 0 : index
    %0 = vector.load %arg1[%c0, %c0_0] : memref<8x111xf32, #tpu.memory_space<vmem>>, vector<8x111xf32>
    %1 = arith.truncf %0 : vector<8x111xf32> to vector<8x111xbf16>
    %c0_1 = arith.constant 0 : index
    %c0_2 = arith.constant 0 : index
    %2 = vector.load %arg2[%c0_1, %c0_2] : memref<111x256xbf16, #tpu.memory_space<vmem>>, vector<111x256xbf16>
    %cst = arith.constant dense<0.000000e+00> : vector<8x256xf32>
    %3 = tpu.matmul %1, %2, %cst {dimension_numbers = #tpu.dot_dimension_numbers<[1], [0], [0], [1], [0, 0, 1, 1], [], []>} : vector<8x111xbf16>, vector<111x256xbf16>, vector<8x256xf32> -> vector<8x256xf32>
    %c0_3 = arith.constant 0 : index
    %c0_4 = arith.constant 0 : index
    %4 = vector.load %arg3[%c0_3, %c0_4] : memref<1x256xf32, #tpu.memory_space<vmem>>, vector<1x256xf32>
    %5 = vector.broadcast %4 : vector<1x256xf32> to vector<8x256xf32>
    %6 = arith.addf %3, %5 : vector<8x256xf32>
    %cst_5 = arith.constant 0.000000e+00 : f32
    %7 = vector.broadcast %cst_5 : f32 to vector<8x256xf32>
    %8 = arith.maximumf %6, %7 : vector<8x256xf32>
    %9 = arith.truncf %8 : vector<8x256xf32> to vector<8x256xbf16>
    %c0_6 = arith.constant 0 : index
    %c0_7 = arith.constant 0 : index
    %10 = vector.load %arg4[%c0_6, %c0_7] : memref<256x256xbf16, #tpu.memory_space<vmem>>, vector<256x256xbf16>
    %cst_8 = arith.constant dense<0.000000e+00> : vector<8x256xf32>
    %11 = tpu.matmul %9, %10, %cst_8 {dimension_numbers = #tpu.dot_dimension_numbers<[1], [0], [0], [1], [0, 0, 1, 1], [], []>} : vector<8x256xbf16>, vector<256x256xbf16>, vector<8x256xf32> -> vector<8x256xf32>
    %c0_9 = arith.constant 0 : index
    %c0_10 = arith.constant 0 : index
    %12 = vector.load %arg5[%c0_9, %c0_10] : memref<1x256xf32, #tpu.memory_space<vmem>>, vector<1x256xf32>
    %13 = vector.broadcast %12 : vector<1x256xf32> to vector<8x256xf32>
    %14 = arith.addf %11, %13 : vector<8x256xf32>
    %cst_11 = arith.constant 0.000000e+00 : f32
    %15 = vector.broadcast %cst_11 : f32 to vector<8x256xf32>
    %16 = arith.maximumf %14, %15 : vector<8x256xf32>
    %17 = arith.truncf %16 : vector<8x256xf32> to vector<8x256xbf16>
    %c0_12 = arith.constant 0 : index
    %c0_13 = arith.constant 0 : index
    %18 = vector.load %arg6[%c0_12, %c0_13] : memref<256x128xbf16, #tpu.memory_space<vmem>>, vector<256x128xbf16>
    %cst_14 = arith.constant dense<0.000000e+00> : vector<8x128xf32>
    %19 = tpu.matmul %17, %18, %cst_14 {dimension_numbers = #tpu.dot_dimension_numbers<[1], [0], [0], [1], [0, 0, 1, 1], [], []>} : vector<8x256xbf16>, vector<256x128xbf16>, vector<8x128xf32> -> vector<8x128xf32>
    %c0_15 = arith.constant 0 : index
    %c0_16 = arith.constant 0 : index
    %20 = vector.load %arg7[%c0_15, %c0_16] : memref<1x128xf32, #tpu.memory_space<vmem>>, vector<1x128xf32>
    %21 = vector.broadcast %20 : vector<1x128xf32> to vector<8x128xf32>
    %22 = arith.addf %19, %21 : vector<8x128xf32>
    %cst_17 = arith.constant 0.000000e+00 : f32
    %23 = vector.broadcast %cst_17 : f32 to vector<8x128xf32>
    %24 = arith.maximumf %22, %23 : vector<8x128xf32>
    %c0_18 = arith.constant 0 : index
    %c0_19 = arith.constant 0 : index
    %25 = vector.load %arg8[%c0_18, %c0_19] : memref<1x128xf32, #tpu.memory_space<vmem>>, vector<1x128xf32>
    %26 = vector.broadcast %25 : vector<1x128xf32> to vector<8x128xf32>
    %27 = arith.mulf %24, %26 : vector<8x128xf32>
    %cst_20 = arith.constant dense<0.000000e+00> : vector<8xf32>
    %28 = vector.multi_reduction <add>, %27, %cst_20 [1] : vector<8x128xf32> to vector<8xf32>
    %29 = vector.shape_cast %28 : vector<8xf32> to vector<8x1xf32>
    %c0_21 = arith.constant 0 : index
    %c0_22 = arith.constant 0 : index
    %30 = vector.load %arg9[%c0_21, %c0_22] : memref<1x1xf32, #tpu.memory_space<vmem>>, vector<1x1xf32>
    %31 = vector.broadcast %30 : vector<1x1xf32> to vector<8x1xf32>
    %32 = arith.addf %29, %31 : vector<8x1xf32>
    %33 = math.absf %32 : vector<8x1xf32>
    %cst_23 = arith.constant 0.000000e+00 : f32
    %34 = vector.broadcast %cst_23 : f32 to vector<8x1xf32>
    %35 = arith.subf %34, %33 : vector<8x1xf32>
    %36 = math.exp %35 : vector<8x1xf32>
    %cst_24 = arith.constant 1.000000e+00 : f32
    %37 = vector.broadcast %cst_24 : f32 to vector<8x1xf32>
    %38 = arith.addf %37, %36 : vector<8x1xf32>
    %39 = math.log %38 : vector<8x1xf32>
    %cst_25 = arith.constant 0.000000e+00 : f32
    %40 = vector.broadcast %cst_25 : f32 to vector<8x1xf32>
    %41 = arith.maximumf %32, %40 : vector<8x1xf32>
    %42 = arith.addf %41, %39 : vector<8x1xf32>
    %cst_26 = arith.constant 0.000000e+00 : f32
    %43 = vector.broadcast %cst_26 : f32 to vector<8x1xf32>
    %44 = arith.subf %43, %42 : vector<8x1xf32>
    %c0_27 = arith.constant 0 : index
    %c0_28 = arith.constant 0 : index
    %45 = vector.load %arg10[%c0_27, %c0_28] : memref<8x2xf32, #tpu.memory_space<vmem>>, vector<8x1xf32>
    tpu.vector_store %arg10[%c0_27, %c0_28], %44 {strides = array<i32>} : memref<8x2xf32, #tpu.memory_space<vmem>>, vector<8x1xf32>,
    %cst_29 = arith.constant 0.000000e+00 : f32
    %46 = vector.broadcast %cst_29 : f32 to vector<8x1xf32>
    %47 = arith.subf %46, %32 : vector<8x1xf32>
    %cst_30 = arith.constant 0.000000e+00 : f32
    %48 = vector.broadcast %cst_30 : f32 to vector<8x1xf32>
    %49 = arith.maximumf %47, %48 : vector<8x1xf32>
    %50 = arith.addf %49, %39 : vector<8x1xf32>
    %cst_31 = arith.constant 0.000000e+00 : f32
    %51 = vector.broadcast %cst_31 : f32 to vector<8x1xf32>
    %52 = arith.subf %51, %50 : vector<8x1xf32>
    %c0_32 = arith.constant 0 : index
    %c1 = arith.constant 1 : index
    %53 = vector.load %arg10[%c0_32, %c1] : memref<8x2xf32, #tpu.memory_space<vmem>>, vector<8x1xf32>
    tpu.vector_store %arg10[%c0_32, %c1], %52 {strides = array<i32>} : memref<8x2xf32, #tpu.memory_space<vmem>>, vector<8x1xf32>,
    return
  }
  func.func @transform_0(%arg0: i32) -> (i32, i32) {
    %c0_i32 = arith.constant 0 : i32
    %c0_i32_0 = arith.constant 0 : i32
    return %arg0, %c0_i32 : i32, i32
  }
  func.func @transform_1(%arg0: i32) -> (i32, i32) {
    %c0_i32 = arith.constant 0 : i32
    %c0_i32_0 = arith.constant 0 : i32
    %c0_i32_1 = arith.constant 0 : i32
    return %c0_i32, %c0_i32_0 : i32, i32
  }
  func.func @transform_2(%arg0: i32) -> (i32, i32) {
    %c0_i32 = arith.constant 0 : i32
    %c0_i32_0 = arith.constant 0 : i32
    %c0_i32_1 = arith.constant 0 : i32
    return %c0_i32, %c0_i32_0 : i32, i32
  }
  func.func @transform_3(%arg0: i32) -> (i32, i32) {
    %c0_i32 = arith.constant 0 : i32
    %c0_i32_0 = arith.constant 0 : i32
    %c0_i32_1 = arith.constant 0 : i32
    return %c0_i32, %c0_i32_0 : i32, i32
  }
  func.func @transform_4(%arg0: i32) -> (i32, i32) {
    %c0_i32 = arith.constant 0 : i32
    %c0_i32_0 = arith.constant 0 : i32
    %c0_i32_1 = arith.constant 0 : i32
    return %c0_i32, %c0_i32_0 : i32, i32
  }
  func.func @transform_5(%arg0: i32) -> (i32, i32) {
    %c0_i32 = arith.constant 0 : i32
    %c0_i32_0 = arith.constant 0 : i32
    %c0_i32_1 = arith.constant 0 : i32
    return %c0_i32, %c0_i32_0 : i32, i32
  }
  func.func @transform_6(%arg0: i32) -> (i32, i32) {
    %c0_i32 = arith.constant 0 : i32
    %c0_i32_0 = arith.constant 0 : i32
    %c0_i32_1 = arith.constant 0 : i32
    return %c0_i32, %c0_i32_0 : i32, i32
  }
  func.func @transform_7(%arg0: i32) -> (i32, i32) {
    %c0_i32 = arith.constant 0 : i32
    %c0_i32_0 = arith.constant 0 : i32
    %c0_i32_1 = arith.constant 0 : i32
    return %c0_i32, %c0_i32_0 : i32, i32
  }
  func.func @transform_8(%arg0: i32) -> (i32, i32) {
    %c0_i32 = arith.constant 0 : i32
    %c0_i32_0 = arith.constant 0 : i32
    %c0_i32_1 = arith.constant 0 : i32
    return %c0_i32, %c0_i32_0 : i32, i32
  }
  func.func @transform_9(%arg0: i32) -> (i32, i32) {
    %c0_i32 = arith.constant 0 : i32
    %c0_i32_0 = arith.constant 0 : i32
    return %arg0, %c0_i32 : i32, i32
  }
}

</mosaic_0001>

<bundles_post_ra>
// kernel: tpu_custom_call.1
= control target key start
LH: loop header
LB: loop body
LE: loop exit
PB: predicated region body
PF: predicated region fallthrough
CT: control target
= control target key end

     0   :  { %s1133_s0 = inlined_call_operand.hbm [shape: f32[8,111], index: 0, kind: input, shape index: {}]   ;;  %s1134_s1 = inlined_call_operand.hbm [shape: bf16[111,256], index: 1, kind: input, shape index: {}]   ;;  %s1135_s2 = inlined_call_operand.vmem [shape: f32[1,256], index: 2, kind: input, shape index: {}]   ;;  %s1136_s3 = inlined_call_operand.hbm [shape: bf16[256,256], index: 3, kind: input, shape index: {}]   ;;  %s1137_s4 = inlined_call_operand.vmem [shape: f32[1,256], index: 4, kind: input, shape index: {}]   ;;  %s1138_s5 = inlined_call_operand.hbm [shape: bf16[256,128], index: 5, kind: input, shape index: {}]   ;;  %s1139_s6 = inlined_call_operand.vmem [shape: f32[1,128], index: 6, kind: input, shape index: {}]   ;;  %s1140_s7 = inlined_call_operand.vmem [shape: f32[1,128], index: 7, kind: input, shape index: {}]   ;;  %s1141_s8 = inlined_call_operand.<no memory space> [shape: f32[1,1], index: 8, kind: input, shape index: {}]   ;;  %s1142_s9 = inlined_call_operand.vmem [shape: f32[8,2], index: 9, kind: output, shape index: {}]  }
   0x1   :  { %v14_v0 = vstv %s1141_s8 }
   0x2   :  { %15 = vst [vmem:[#allocation2] sm:$0x1] %v14_v0 }
   0x3   :  { %16 = vsyncpa [#allocation4], 0 }
   0x4   :  { %17 = vsyncpa [#allocation6], 0 }
   0x5   :  { %18 = vsyncpa [#allocation9], 0  ;;  %s997_s11 = smov [#allocation5]   ;;  %s903_s15 = scalar_lea.hbm %s1134_s1, 1792 }
   0x6   :  { %s34_s12 = sshll.u32 %s997_s11, 4  ;;  %p904_p0 = scmp.ne.s32.totalorder %s1134_s1, %s903_s15  ;;  %s35_s12 = int_to_ptr.vmem [resolvable:$true] %s34_s12 }
   0x7   :  { %p907_p1 = scmp.lt.u32.totalorder %s903_s15, %s1134_s1 }
   0x9   :  { %p909_p2 = pnand %p907_p1, %p904_p0 }
   0xb   :  { %912 = shalt.err (!%p909_p2)
}
   0xc   :  { %s913_s8 = scalar_lea.vmem %s35_s12, 1792  ;;  %p918_p4 = scmp.lt.s32.totalorder %s35_s12, %s35_s12 }
   0xd   :  { %p914_p3 = scmp.ne.s32.totalorder %s35_s12, %s913_s8  ;;  %p919_p5 = scmp.lt.s32.totalorder %s913_s8, %s913_s8 }
   0xf   :  { %p920_p6 = por %p919_p5, %p918_p4 }
  0x11   :  { %p921_p7 = pnand %p920_p6, %p914_p3 }
  0x13   :  { %924 = shalt.err (!%p921_p7)
}
  0x14   :  { %s998_s20 = smov 128   ;;  %s999_s21 = smov 8  }
  0x15   :  { %40 = dma.hbm_to_vmem [thread:$0]  %s1134_s1, 1792, %s35_s12, [#allocation6], %s998_s20, %s998_s20, %s999_s21  }
  0x16   :  { %s1000_s24 = smov [#allocation3]   ;;  %s1001_s26 = smov [#allocation7]  }
  0x17   :  { %s25_s25 = sshll.u32 %s1000_s24, 4  ;;  %s48_s27 = sshll.u32 %s1001_s26, 4  ;;  %s26_s25 = int_to_ptr.vmem [resolvable:$true] %s25_s25  ;;  %s49_s27 = int_to_ptr.vmem [resolvable:$true] %s48_s27 }
  0x18   :  { %s925_s30 = scalar_lea.hbm %s1133_s0, 128 }
  0x19   :  { %p926_p8 = scmp.ne.s32.totalorder %s1133_s0, %s925_s30  ;;  %p929_p9 = scmp.lt.u32.totalorder %s925_s30, %s1133_s0 }
  0x1b   :  { %p931_p10 = pnand %p929_p9, %p926_p8 }
  0x1d   :  { %934 = shalt.err (!%p931_p10)
}
  0x1e   :  { %s935_s1 = scalar_lea.vmem %s26_s25, 128  ;;  %p940_p12 = scmp.lt.s32.totalorder %s26_s25, %s26_s25 }
  0x1f   :  { %p936_p11 = scmp.ne.s32.totalorder %s26_s25, %s935_s1  ;;  %p941_p13 = scmp.lt.s32.totalorder %s935_s1, %s935_s1 }
  0x21   :  { %p942_p0 = por %p941_p13, %p940_p12 }
  0x23   :  { %p943_p1 = pnand %p942_p0, %p936_p11 }
  0x25   :  { %946 = shalt.err (!%p943_p1)
}
  0x26   :  { %28 = dma.hbm_to_vmem [thread:$0]  %s1133_s0, 128, %s26_s25, [#allocation4]  }
  0x27   :  { %s947_s18 = scalar_lea.hbm %s1136_s3, 4096 }
  0x28   :  { %p948_p2 = scmp.ne.s32.totalorder %s1136_s3, %s947_s18  ;;  %p951_p3 = scmp.lt.u32.totalorder %s947_s18, %s1136_s3 }
  0x2a   :  { %p953_p4 = pnand %p951_p3, %p948_p2 }
  0x2c   :  { %956 = shalt.err (!%p953_p4)
}
  0x2d   :  { %s957_s24 = scalar_lea.vmem %s49_s27, 4096  ;;  %p962_p6 = scmp.lt.s32.totalorder %s49_s27, %s49_s27 }
  0x2e   :  { %p958_p5 = scmp.ne.s32.totalorder %s49_s27, %s957_s24  ;;  %p963_p7 = scmp.lt.s32.totalorder %s957_s24, %s957_s24 }
  0x30   :  { %p964_p8 = por %p963_p7, %p962_p6 }
  0x32   :  { %p965_p9 = pnand %p964_p8, %p958_p5 }
  0x34   :  { %968 = shalt.err (!%p965_p9)
}
  0x35   :  { %54 = dma.hbm_to_vmem [thread:$0]  %s1136_s3, 4096, %s49_s27, [#allocation6], %s998_s20, %s998_s20, %s999_s21  }
  0x36   :  { %s1002_s26 = smov [#allocation8]   ;;  %s969_s10 = scalar_lea.hbm %s1138_s5, 2048 }
  0x37   :  { %s62_s28 = sshll.u32 %s1002_s26, 4  ;;  %p970_p10 = scmp.ne.s32.totalorder %s1138_s5, %s969_s10  ;;  %s63_s28 = int_to_ptr.vmem [resolvable:$true] %s62_s28 }
  0x38   :  { %p973_p11 = scmp.lt.u32.totalorder %s969_s10, %s1138_s5 }
  0x3a   :  { %p975_p12 = pnand %p973_p11, %p970_p10 }
  0x3c   :  { %978 = shalt.err (!%p975_p12)
}
  0x3d   :  { %s979_s12 = scalar_lea.vmem %s63_s28, 2048  ;;  %p984_p0 = scmp.lt.s32.totalorder %s63_s28, %s63_s28 }
  0x3e   :  { %p980_p13 = scmp.ne.s32.totalorder %s63_s28, %s979_s12  ;;  %p985_p1 = scmp.lt.s32.totalorder %s979_s12, %s979_s12 }
  0x40   :  { %p986_p2 = por %p985_p1, %p984_p0 }
  0x42   :  { %p987_p3 = pnand %p986_p2, %p980_p13 }
  0x44   :  { %990 = shalt.err (!%p987_p3)
}
  0x45   :  { %s1003_s3 = smov 64   ;;  %s1004_s20 = smov 4  }
  0x46   :  { %68 = dma.hbm_to_vmem [thread:$0]  %s1138_s5, 2048, %s63_s28, [#allocation9], %s1003_s3, %s1003_s3, %s1004_s20  }
  0x47   :  { %991 = dma.done.wait [#allocation4], 128  }
  0x48   :  { %992 = vsyncadd [#allocation4], 4294967168 }
  0x49   :  { %993 = dma.done.wait [#allocation6], 5888  }
  0x4a   :  { %994 = vsyncadd [#allocation6], 4294961408 }
  0x4b   :  { %995 = dma.done.wait [#allocation9], 2048  }
  0x4c   :  { %996 = vsyncadd [#allocation9], 4294965248  ;;  %v1005_v1 = vmov 0   ;;  %v814_v2 = vld [vmem:[#allocation5 + $0x4] ss:$8 sps:$4 sm:$0xff]   ;;  %vm188_vm0 = vcmask 1046528  }
  0x4d   :  { %230 = vmatprep.mubr.bf16.mxu0 %v1005_v1  ;;  %v816_v3 = vld [vmem:[#allocation5] ss:$8 sps:$4 sm:$0xff]   ;;  %198 = vmatprep.subr.bf16.mxu0 %v814_v2  ;;  %v817_v4 = vld [vmem:[#allocation5 + $0x14] ss:$8 sps:$4 sm:$0xff]   ;;  %v819_v5 = vld [vmem:[#allocation5 + $0x10] ss:$8 sps:$4 sm:$0xff]  }
  0x4e   :  { %199 = vmatpush1.bf16.msra.mxu0 %v816_v3  ;;  %v820_v6 = vld [vmem:[#allocation5 + $0x24] ss:$8 sps:$4 sm:$0xff]   ;;  %v822_v7 = vld [vmem:[#allocation5 + $0x20] ss:$8 sps:$4 sm:$0xff]   ;;  %v823_v8 = vld [vmem:[#allocation5 + $0x34] ss:$8 sps:$4 sm:$0xff]   ;;  %v106_v3 = vlaneseq }
  0x4f   :  { %200 = vmatprep.subr.bf16.mxu0 %v817_v4  ;;  %v825_v9 = vld [vmem:[#allocation5 + $0x30] ss:$8 sps:$4 sm:$0xff]   ;;  %v835_v10 = vld [vmem:[#allocation7 + $0x4] ss:$8 sps:$4 sm:$0xff]   ;;  %v838_v12 = vld [vmem:[#allocation7 + $0x14] ss:$8 sps:$4 sm:$0xff]  }
  0x50   :  { %v837_v11 = vld [vmem:[#allocation7] ss:$8 sps:$4 sm:$0xff]   ;;  %v826_v13 = vld [vmem:[#allocation5 + $0x44] ss:$8 sps:$4 sm:$0xff]   ;;  %447 = vmatprep.subr.bf16.mxu1 %v835_v10  ;;  %vm189_vm1 = vcmask 1047552   ;;  %v1006_v16 = vmov 65535  }
  0x51   :  { %448 = vmatpush1.bf16.msra.mxu1 %v837_v11  ;;  %v840_v14 = vld [vmem:[#allocation7 + $0x10] ss:$8 sps:$4 sm:$0xff]   ;;  %v190_v17 = vsel %vm188_vm0, 4294967295, %v1006_v16  ;;  %v841_v18 = vld [vmem:[#allocation7 + $0x24] ss:$8 sps:$4 sm:$0xff]   ;;  %vm184_vm2 = vcmask 908288  }
  0x52   :  { %201 = vmatpush1.bf16.msra.mxu0 %v819_v5  ;;  %v828_v15 = vld [vmem:[#allocation5 + $0x40] ss:$8 sps:$4 sm:$0xff]   ;;  %449 = vmatprep.subr.bf16.mxu1 %v838_v12  ;;  %v829_v19 = vld [vmem:[#allocation5 + $0x54] ss:$8 sps:$4 sm:$0xff]   ;;  %v832_v20 = vld [vmem:[#allocation5 + $0x64] ss:$8 sps:$4 sm:$0xff]  }
  0x53   :  { %202 = vmatprep.subr.bf16.mxu0 %v820_v6  ;;  %v191_v21 = vsel %vm189_vm1, %v190_v17, 0  ;;  %v843_v22 = vld [vmem:[#allocation7 + $0x20] ss:$8 sps:$4 sm:$0xff]   ;;  %v844_v24 = vld [vmem:[#allocation7 + $0x34] ss:$8 sps:$4 sm:$0xff]   ;;  %v107_v4 = vshrl.u32 %v106_v3, 7 }
  0x54   :  { %v831_v23 = vld [vmem:[#allocation5 + $0x50] ss:$8 sps:$4 sm:$0xff]   ;;  %v834_v25 = vld [vmem:[#allocation5 + $0x60] ss:$8 sps:$4 sm:$0xff]   ;;  %v196_v26 = vand.u32 %v832_v20, %v191_v21  ;;  %v847_v28 = vld [vmem:[#allocation7 + $0x44] ss:$8 sps:$4 sm:$0xff]  }
  0x55   :  { %450 = vmatpush1.bf16.msra.mxu1 %v840_v14  ;;  %v846_v27 = vld [vmem:[#allocation7 + $0x30] ss:$8 sps:$4 sm:$0xff]   ;;  %v193_v29 = vand.u32 %v834_v25, %v191_v21  ;;  %v88_v30 = vld [vmem:[#allocation3] sm:$0xff]  ;;  %v850_v33 = vld [vmem:[#allocation7 + $0x54] ss:$8 sps:$4 sm:$0xff]   ;;  %v108_v5 = vsub.s32 0, %v107_v4 }
  0x56   :  { %203 = vmatpush1.bf16.msra.mxu0 %v822_v7  ;;  %451 = vmatprep.subr.bf16.mxu1 %v841_v18  ;;  %v849_v31 = vld [vmem:[#allocation7 + $0x40] ss:$8 sps:$4 sm:$0xff]   ;;  %v89_v32 = vpack.c.bf16 %v88_v30, %v88_v30  ;;  %v852_v34 = vld [vmem:[#allocation7 + $0x50] ss:$8 sps:$4 sm:$0xff]   ;;  %v853_v35 = vld [vmem:[#allocation7 + $0x64] ss:$8 sps:$4 sm:$0xff]  }
  0x57   :  { %204 = vmatprep.subr.bf16.mxu0 %v823_v8  ;;  %v855_v36 = vld [vmem:[#allocation7 + $0x60] ss:$8 sps:$4 sm:$0xff]   ;;  %v856_v37 = vld [vmem:[#allocation7 + $0x74] ss:$8 sps:$4 sm:$0xff]   ;;  %v858_v38 = vld [vmem:[#allocation7 + $0x70] ss:$8 sps:$4 sm:$0xff]  }
  0x58   :  { %v859_v39 = vld [vmem:[#allocation7 + $0x84] ss:$8 sps:$4 sm:$0xff]   ;;  %v861_v40 = vld [vmem:[#allocation7 + $0x80] ss:$8 sps:$4 sm:$0xff]   ;;  %v862_v41 = vld [vmem:[#allocation7 + $0x94] ss:$8 sps:$4 sm:$0xff]  }
  0x59   :  { %452 = vmatpush1.bf16.msra.mxu1 %v843_v22  ;;  %v864_v42 = vld [vmem:[#allocation7 + $0x90] ss:$8 sps:$4 sm:$0xff]   ;;  %v865_v43 = vld [vmem:[#allocation7 + $0xa4] ss:$8 sps:$4 sm:$0xff]   ;;  %v867_v44 = vld [vmem:[#allocation7 + $0xa0] ss:$8 sps:$4 sm:$0xff]  }
  0x5a   :  { %205 = vmatpush1.bf16.msra.mxu0 %v825_v9  ;;  %453 = vmatprep.subr.bf16.mxu1 %v844_v24  ;;  %v868_v45 = vld [vmem:[#allocation7 + $0xb4] ss:$8 sps:$4 sm:$0xff]   ;;  %v870_v46 = vld [vmem:[#allocation7 + $0xb0] ss:$8 sps:$4 sm:$0xff]   ;;  %v871_v47 = vld [vmem:[#allocation7 + $0xc4] ss:$8 sps:$4 sm:$0xff]  }
  0x5b   :  { %206 = vmatprep.subr.bf16.mxu0 %v826_v13  ;;  %v873_v48 = vld [vmem:[#allocation7 + $0xc0] ss:$8 sps:$4 sm:$0xff]   ;;  %v874_v49 = vld [vmem:[#allocation7 + $0xd4] ss:$8 sps:$4 sm:$0xff]   ;;  %v876_v50 = vld [vmem:[#allocation7 + $0xd0] ss:$8 sps:$4 sm:$0xff]  }
  0x5c   :  { %v877_v51 = vld [vmem:[#allocation7 + $0xe4] ss:$8 sps:$4 sm:$0xff]   ;;  %v879_v52 = vld [vmem:[#allocation7 + $0xe0] ss:$8 sps:$4 sm:$0xff]   ;;  %v880_v53 = vld [vmem:[#allocation7 + $0xf4] ss:$8 sps:$4 sm:$0xff]  }
  0x5d   :  { %454 = vmatpush1.bf16.msra.mxu1 %v846_v27  ;;  %v882_v54 = vld [vmem:[#allocation7 + $0xf0] ss:$8 sps:$4 sm:$0xff]   ;;  %v883_v55 = vld [vmem:[#allocation8 + $0x40] sm:$0xff]   ;;  %v885_v57 = vld [vmem:[#allocation8 + $0x48] sm:$0xff]   ;;  %v112_v7 = vsub.s32 1, %v107_v4  ;;  %vm696_vm3 = vcmask 7168  }
  0x5e   :  { %207 = vmatpush1.bf16.msra.mxu0 %v828_v15  ;;  %455 = vmatprep.subr.bf16.mxu1 %v847_v28  ;;  %v884_v56 = vld [vmem:[#allocation8] sm:$0xff]   ;;  %v886_v58 = vld [vmem:[#allocation8 + $0x8] sm:$0xff]   ;;  %v887_v59 = vld [vmem:[#allocation8 + $0x50] sm:$0xff]   ;;  %vm706_vm4 = vcmask 15368  }
  0x5f   :  { %208 = vmatprep.subr.bf16.mxu0 %v829_v19  ;;  %v888_v60 = vld [vmem:[#allocation8 + $0x10] sm:$0xff]   ;;  %v889_v61 = vld [vmem:[#allocation8 + $0x58] sm:$0xff]   ;;  %v891_v63 = vld [vmem:[#allocation8 + $0x60] sm:$0xff]  }
  0x60   :  { %v890_v62 = vld [vmem:[#allocation8 + $0x18] sm:$0xff]   ;;  %v892_v0 = vld [vmem:[#allocation8 + $0x20] sm:$0xff]   ;;  %v893_v1 = vld [vmem:[#allocation8 + $0x68] sm:$0xff]  }
  0x61   :  { %456 = vmatpush1.bf16.msra.mxu1 %v849_v31  ;;  %v894_v2 = vld [vmem:[#allocation8 + $0x28] sm:$0xff]   ;;  %v895_v20 = vld [vmem:[#allocation8 + $0x70] sm:$0xff]   ;;  %v897_v22 = vld [vmem:[#allocation8 + $0x78] sm:$0xff]  }
  0x62   :  { %209 = vmatpush1.bf16.msra.mxu0 %v831_v23  ;;  %457 = vmatprep.subr.bf16.mxu1 %v850_v33  ;;  %v104_v6 = vld [vmem:[%s1135_s2] sm:$0x3]  ;;  %v896_v21 = vld [vmem:[#allocation8 + $0x30] sm:$0xff]   ;;  %v898_v23 = vld [vmem:[#allocation8 + $0x38] sm:$0xff]  }
  0x63   :  { %210 = vmatprep.subr.bf16.mxu0 %v196_v26  ;;  %v109_v8 = vrot.slane %v104_v6, %v108_v5  ;;  %v113_v9 = vrot.slane %v104_v6, %v112_v7  ;;  %v275_v24 = vld [vmem:[%s1137_s4] sm:$0x3] }
  0x64   :  { %v280_v25 = vrot.slane %v275_v24, %v108_v5  ;;  %v284_v26 = vrot.slane %v275_v24, %v112_v7 }
  0x65   :  { %458 = vmatpush1.bf16.msra.mxu1 %v852_v34 }
  0x66   :  { %211 = vmatpush1.bf16.msra.mxu0 %v193_v29  ;;  %459 = vmatprep.subr.bf16.mxu1 %v853_v35 }
  0x67   :  { %781 = vmatprep.subr.bf16.mxu0 %v883_v55 }
  0x69   :  { %729 = vmatmul.mubr.msk.bf16.vlgmr.msra.gmra.mrb[0].mxu0 %vm184_vm2, %v89_v32  ;;  %460 = vmatpush1.bf16.msra.mxu1 %v855_v36 }
  0x6a   :  { %461 = vmatprep.subr.bf16.mxu1 %v856_v37  ;;  %782 = vmatpush3.bf16.msra.mxu0 %v884_v56 }
  0x6b   :  { %783 = vmatprep.subr.bf16.mxu0 %v885_v57 }
  0x6d   :  { %462 = vmatpush1.bf16.msra.mxu1 %v858_v38 }
  0x6e   :  { %463 = vmatprep.subr.bf16.mxu1 %v859_v39  ;;  %784 = vmatpush3.bf16.msra.mxu0 %v886_v58  ;;  %v762_v39 = vld [vmem:[%s1139_s6] ss:$0 sm:$0xff]  ;;  %s1007_s6 = smov 1  }
  0x6f   :  { %785 = vmatprep.subr.bf16.mxu0 %v887_v59 }
  0x71   :  { %464 = vmatpush1.bf16.msra.mxu1 %v861_v40 }
  0x72   :  { %465 = vmatprep.subr.bf16.mxu1 %v862_v41  ;;  %786 = vmatpush3.bf16.msra.mxu0 %v888_v60 }
  0x73   :  { %787 = vmatprep.subr.bf16.mxu0 %v889_v61 }
  0x75   :  { %466 = vmatpush1.bf16.msra.mxu1 %v864_v42 }
  0x76   :  { %467 = vmatprep.subr.bf16.mxu1 %v865_v43  ;;  %788 = vmatpush3.bf16.msra.mxu0 %v890_v62 }
  0x77   :  { %789 = vmatprep.subr.bf16.mxu0 %v891_v63 }
  0x79   :  { %468 = vmatpush1.bf16.msra.mxu1 %v867_v44  ;;  %v779_v44 = vld [vmem:[%s1140_s7] ss:$0 sm:$0xff] }
  0x7a   :  { %469 = vmatprep.subr.bf16.mxu1 %v868_v45  ;;  %790 = vmatpush3.bf16.msra.mxu0 %v892_v0 }
  0x7b   :  { %791 = vmatprep.subr.bf16.mxu0 %v893_v1 }
  0x7d   :  { %470 = vmatpush1.bf16.msra.mxu1 %v870_v46 }
  0x7e   :  { %471 = vmatprep.subr.bf16.mxu1 %v871_v47  ;;  %792 = vmatpush3.bf16.msra.mxu0 %v894_v2  ;;  %v780_v47 = vld [vmem:[#allocation2] ss:$0 sm:$0xff] }
  0x7f   :  { %793 = vmatprep.subr.bf16.mxu0 %v895_v20 }
  0x81   :  { %472 = vmatpush1.bf16.msra.mxu1 %v873_v48 }
  0x82   :  { %473 = vmatprep.subr.bf16.mxu1 %v874_v49  ;;  %794 = vmatpush3.bf16.msra.mxu0 %v896_v21 }
  0x83   :  { %795 = vmatprep.subr.bf16.mxu0 %v897_v22 }
  0x85   :  { %474 = vmatpush1.bf16.msra.mxu1 %v876_v50 }
  0x86   :  { %475 = vmatprep.subr.bf16.mxu1 %v877_v51  ;;  %796 = vmatpush3.bf16.msra.mxu0 %v898_v23 }
  0x89   :  { %476 = vmatpush1.bf16.msra.mxu1 %v879_v52 }
  0x8a   :  { %477 = vmatprep.subr.bf16.mxu1 %v880_v53 }
  0x8d   :  { %478 = vmatpush1.bf16.msra.mxu1 %v882_v54 }
 0x13c   :  { %v232_v10 = vpop.f32.mrb[0].mxu0 }
 0x13d   :  { %v233_v11 = vadd.f32 %v232_v10, %v109_v8  ;;  %v234_v12 = vpop.f32.mrb[1].mxu0 }
 0x13e   :  { %v235_v13 = vadd.f32 %v234_v12, %v113_v9  ;;  %v236_v14 = vpop.f32.mrb[2].mxu0 }
 0x13f   :  { %v239_v15 = vmax.f32 %v233_v11, 0.0  ;;  %v237_v16 = vpop.f32.mrb[3].mxu0 }
 0x140   :  { %v240_v17 = vmax.f32 %v235_v13, 0.0 }
 0x141   :  { %v241_v19 = vpack.c.bf16 %v239_v15, %v239_v15 }
 0x142   :  { %v242_v18 = vpack.c.bf16 %v240_v17, %v240_v17 }
 0x144   :  { %479 = vmatprep.mubr.bf16.mxu1 %v242_v18 }
 0x145   :  { %480 = vmatmul.mubr.bf16.vlgmr.msra.gmra.mrb[0].mxu1 %v241_v19 }
 0x218   :  { %v481_v27 = vpop.f32.mrb[0].mxu1 }
 0x219   :  { %v482_v28 = vadd.f32 %v481_v27, %v280_v25  ;;  %v483_v29 = vpop.f32.mrb[1].mxu1 }
 0x21a   :  { %v484_v30 = vadd.f32 %v483_v29, %v284_v26  ;;  %v485_v31 = vpop.f32.mrb[2].mxu1 }
 0x21b   :  { %v488_v32 = vmax.f32 %v482_v28, 0.0  ;;  %v486_v33 = vpop.f32.mrb[3].mxu1 }
 0x21c   :  { %v489_v34 = vmax.f32 %v484_v30, 0.0 }
 0x21d   :  { %v490_v36 = vpack.c.bf16 %v488_v32, %v488_v32 }
 0x21e   :  { %v491_v35 = vpack.c.bf16 %v489_v34, %v489_v34 }
 0x220   :  { %659 = vmatprep.mubr.bf16.mxu0 %v491_v35 }
 0x221   :  { %660 = vmatmul.mubr.bf16.vlgmr.msra.gmra.mrb[4].mxu0 %v490_v36 }
 0x2f4   :  { %v797_v37 = vpop.f32.mrb[4].mxu0 }
 0x2f5   :  { %v798_v38 = vpop.f32.mrb[5].mxu0 }
 0x2f6   :  { %v799_v40 = vadd.f32 %v798_v38, %v797_v37  ;;  %v800_v41 = vpop.f32.mrb[6].mxu0 }
 0x2f7   :  { %v801_v42 = vpop.f32.mrb[7].mxu0 }
 0x2f8   :  { %v662_v43 = vadd.f32 %v799_v40, %v762_v39 }
 0x2fa   :  { %v667_v45 = vmax.f32 %v662_v43, 0.0 }
 0x2fc   :  { %v675_v46 = vmul.f32 %v779_v44, %v667_v45 }
 0x2fe   :  { %676 = vadd.xlane.f32.xlu0 %v675_v46 }
 0x38b   :  { %v677_v48 = vpop.xlane.xlu0 %676 }
 0x38c   :  { %v685_v49 = vadd.f32 %v780_v47, %v677_v48 }
 0x38e   :  { %v686_v50 = vand.u32 2147483647, %v685_v49  ;;  %v698_v55 = vsub.f32 0.0, %v685_v49  ;;  %v693_v57 = vmax.f32 %v685_v49, 0.0 }
 0x390   :  { %v687_v51 = vsub.f32 0.0, %v686_v50  ;;  %v699_v58 = vmax.f32 %v698_v55, 0.0 }
 0x392   :  { %v688_v52 = vmul.f32 1.442695, %v687_v51 }
 0x394   :  { %899 = vpow2.f32 %v688_v52 }
 0x39e   :  { %v900_v53 = vpop.eup %899 }
 0x39f   :  { %v690_v54 = vadd.f32 1.0, %v900_v53 }
 0x3a1   :  { %901 = vlog2.f32 %v690_v54 }
 0x3ab   :  { %v902_v56 = vpop.eup %901 }
 0x3ac   :  { %v692_v59 = vmul.f32 0.6931472, %v902_v56 }
 0x3ae   :  { %v700_v60 = vadd.f32 %v699_v58, %v692_v59  ;;  %v694_v61 = vadd.f32 %v693_v57, %v692_v59 }
 0x3b0   :  { %v701_v62 = vsub.f32 0.0, %v700_v60  ;;  %v695_v63 = vsub.f32 0.0, %v694_v61 }
 0x3b2   :  { %703 = vrot.lane.b32.xlu0 %v701_v62, %s1007_s6  ;;  %697 = vst.msk [vmem:[%s1142_s9] sm:$0xff] %vm696_vm3, %v695_v63 }
 0x424   :  { %v704_v0 = vpop.permute.xlu0 %703 }
 0x425   :  { %707 = vst.msk [vmem:[%s1142_s9] sm:$0xff] %vm706_vm4, %v704_v0 }
 0x426   :  { %712 = vsyncpa [#allocation4], 1 }
 0x427   :  { %713 = vsyncpa [#allocation6], 1 }
 0x428   :  { %714 = vsyncpa [#allocation9], 1 }

</bundles_post_ra>
